<compile_context>
chip_gen: v7x
topology: tpu7x:2x2x1
jax: 0.10.0
libtpu: 0.0.40
codegen_flags: <defaults>
</compile_context>

<pallas_src>
import functools

import jax
import jax.numpy as jnp
from jax import lax
from jax.experimental import pallas as pl
from jax.experimental.pallas import tpu as pltpu


_LANE = 128          # lane width: pad F (and small C) up to a multiple of this
_NEG_BIG = -1e30     # bias padding value: padded classes never win argmax
_TINY = 1e-30        # rsqrt guard for zero-energy (padded) rows


def _round_up(x: int, m: int) -> int:
    return ((x + m - 1) // m) * m


# ----------------------------------------------------------------------------
# Kernels
# ----------------------------------------------------------------------------
def _logits(f, w, b):
    # f: [TB, Fp], w: [Cp, Fp], b: [1, Cp]  ->  f @ W^T + b : [TB, Cp]
    y = lax.dot_general(f, w, (((1,), (1,)), ((), ())),
                        preferred_element_type=jnp.float32)
    return y + b


def plain_kernel(f_ref, w_ref, b_ref, y_ref):
    y_ref[...] = _logits(f_ref[...], w_ref[...], b_ref[...]).astype(y_ref.dtype)


def _toalign_core(f, w_sel, w, b):
    # f, w_sel: [TB, Fp];  w: [Cp, Fp];  b: [1, Cp]
    eng_org = jnp.sum(f * f, axis=1, keepdims=True)                 # [TB, 1]
    fw = f * w_sel
    eng_aft = jnp.sum(fw * fw, axis=1, keepdims=True)               # [TB, 1]
    # sqrt(eng_org / eng_aft) -> sqrt * rsqrt (divide moves to the EUP slot);
    # clamp so zero-energy (padded) rows give 0 instead of NaN.
    scalar = jnp.sqrt(eng_org) * lax.rsqrt(jnp.maximum(eng_aft, _TINY))
    f_pos = fw * scalar                                # == f * (w_sel * scalar)
    y_pos = _logits(f_pos, w, b)
    return f_pos, y_pos


def toalign_kernel(f_ref, w_ref, b_ref, labels_ref, f_pos_ref, y_pos_ref):
    f = f_ref[...]                                   # [TB, Fp]
    w = w_ref[...]                                   # [Cp, Fp]
    b = b_ref[...]                                   # [1,  Cp]
    labels = labels_ref[...]                         # [TB, 1] int32
    tb, cp = f.shape[0], w.shape[0]
    # gather W[labels] via a one-hot matmul (MXU-friendly for small/medium C).
    iota_c = lax.broadcasted_iota(jnp.int32, (tb, cp), 1)
    onehot = (iota_c == labels).astype(jnp.float32)                 # [TB, Cp]
    w_sel = jnp.dot(onehot, w, preferred_element_type=jnp.float32)  # [TB, Fp]
    f_pos, y_pos = _toalign_core(f, w_sel, w, b)
    f_pos_ref[...] = f_pos.astype(f_pos_ref.dtype)
    y_pos_ref[...] = y_pos.astype(y_pos_ref.dtype)


def taskalign_kernel(f_ref, w_ref, b_ref, f_pos_ref, y_pos_ref):
    f = f_ref[...]                                   # [TB, Fp]
    w = w_ref[...]                                   # [Cp, Fp]
    b = b_ref[...]                                   # [1,  Cp]
    tb, cp = f.shape[0], w.shape[0]
    # pseudo labels = argmax(softmax(fc(f))) == argmax(fc(f)) (softmax monotone)
    y0 = _logits(f, w, b)                                           # [TB, Cp]
    iota_c = lax.broadcasted_iota(jnp.int32, (tb, cp), 1)
    row_max = jnp.max(y0, axis=1, keepdims=True)
    # first-max index (matches torch.argmax tie-breaking); padded classes have
    # bias -1e30 so they never win.
    idx = jnp.min(jnp.where(y0 == row_max, iota_c, cp), axis=1, keepdims=True)
    onehot = (iota_c == idx).astype(jnp.float32)                    # [TB, Cp]
    w_sel = jnp.dot(onehot, w, preferred_element_type=jnp.float32)  # [TB, Fp]
    f_pos, y_pos = _toalign_core(f, w_sel, w, b)
    f_pos_ref[...] = f_pos.astype(f_pos_ref.dtype)
    y_pos_ref[...] = y_pos.astype(y_pos_ref.dtype)


# ----------------------------------------------------------------------------
# pallas_call wrappers (batch-tiled grid, single-buffered resident weights)
# ----------------------------------------------------------------------------
def _f_spec(tb, fp):
    return pl.BlockSpec((tb, fp), lambda i: (i, 0))


def _resident(shape):
    # constant index_map -> grid-resident block; single-buffer it (the second
    # pipeline buffer would be pure VMEM waste).
    return pl.BlockSpec(shape, lambda i: (0, 0), pipeline_mode=pl.Buffered(1))


def _compiler_params(tb, fp, cp, has_fpos_out):
    # Rough per-call VMEM footprint: single-buffered resident weight + bias,
    # double-buffered input/output tiles, 2x margin for temporaries.
    resident = (cp * fp + cp) * 4
    tiles = 2 * (tb * fp + tb * cp + tb) * 4
    if has_fpos_out:
        tiles += 2 * tb * fp * 4
    need = 2 * (resident + tiles) + (4 << 20)
    if need <= (16 << 20):   # fits every generation's scoped-VMEM default
        return pltpu.CompilerParams(dimension_semantics=("parallel",))
    return pltpu.CompilerParams(dimension_semantics=("parallel",),
                                vmem_limit_bytes=min(need, 56 << 20))


@functools.partial(jax.jit, static_argnames=("tb",))
def _plain_call(f, w, b, tb):
    bp, fp = f.shape
    cp = w.shape[0]
    return pl.pallas_call(
        plain_kernel,
        out_shape=jax.ShapeDtypeStruct((bp, cp), f.dtype),
        grid=(bp // tb,),
        in_specs=[_f_spec(tb, fp), _resident((cp, fp)), _resident((1, cp))],
        out_specs=pl.BlockSpec((tb, cp), lambda i: (i, 0)),
        compiler_params=_compiler_params(tb, fp, cp, False),
    )(f, w, b)


@functools.partial(jax.jit, static_argnames=("tb",))
def _toalign_call(f, w, b, labels2d, tb):
    bp, fp = f.shape
    cp = w.shape[0]
    return pl.pallas_call(
        toalign_kernel,
        out_shape=(jax.ShapeDtypeStruct((bp, fp), f.dtype),
                   jax.ShapeDtypeStruct((bp, cp), f.dtype)),
        grid=(bp // tb,),
        in_specs=[_f_spec(tb, fp),
                  _resident((cp, fp)),
                  _resident((1, cp)),
                  pl.BlockSpec((tb, 1), lambda i: (i, 0))],
        out_specs=(pl.BlockSpec((tb, fp), lambda i: (i, 0)),
                   pl.BlockSpec((tb, cp), lambda i: (i, 0))),
        compiler_params=_compiler_params(tb, fp, cp, True),
    )(f, w, b, labels2d)


@functools.partial(jax.jit, static_argnames=("tb",))
def _taskalign_call(f, w, b, tb):
    bp, fp = f.shape
    cp = w.shape[0]
    return pl.pallas_call(
        taskalign_kernel,
        out_shape=(jax.ShapeDtypeStruct((bp, fp), f.dtype),
                   jax.ShapeDtypeStruct((bp, cp), f.dtype)),
        grid=(bp // tb,),
        in_specs=[_f_spec(tb, fp),
                  _resident((cp, fp)),
                  _resident((1, cp))],
        out_specs=(pl.BlockSpec((tb, fp), lambda i: (i, 0)),
                   pl.BlockSpec((tb, cp), lambda i: (i, 0))),
        compiler_params=_compiler_params(tb, fp, cp, True),
    )(f, w, b)


# ----------------------------------------------------------------------------
# Model wrapper (identity backbone + fc head); padding handled outside kernels
# ----------------------------------------------------------------------------
class BaseModelPallas:
    """JAX/Pallas equivalent of TLA BaseModel (identity backbone + fc head)."""

    def __init__(self, fdim: int, num_classes: int, key):
        self.fdim = fdim
        self.num_classes = num_classes
        # nn.init.kaiming_normal_(fc.weight): std = sqrt(2 / fan_in)
        std = (2.0 / fdim) ** 0.5
        self.fc_weight = (jax.random.normal(key, (num_classes, fdim),
                                            jnp.float32) * std)      # [C, F]
        self.fc_bias = jnp.zeros((num_classes,), jnp.float32)        # [C]

        # Lane-dense padded copies (built once).  Class dim 256-aligned when
        # large (v6e/v7x 2x256 MXU), 128 otherwise.
        c_align = 256 if num_classes > _LANE else _LANE
        self.fp = _round_up(fdim, _LANE)
        self.cp = _round_up(num_classes, c_align)
        self.w_cf = jnp.pad(self.fc_weight,
                            ((0, self.cp - num_classes),
                             (0, self.fp - fdim)))                   # [Cp, Fp]
        self.b_row = jnp.pad(self.fc_bias, (0, self.cp - num_classes),
                             constant_values=_NEG_BIG).reshape(1, self.cp)

    @staticmethod
    def _choose_tiling(b: int):
        """Pick (TB, BP): largest tile wasting <= ~12.5% padded rows, then
        force >= 2 grid steps so v7x megacore can actually split the grid."""
        b8 = _round_up(max(b, 1), 8)
        allow = b8 // 8
        tb, bp = 8, b8
        for cand in (256, 128, 64, 32, 16):
            cbp = _round_up(b8, cand)
            if cbp - b8 <= allow:
                tb, bp = cand, cbp
                break
        if bp // tb < 2 and tb > 8:
            tb //= 2
        return tb, bp

    def forward(self, x, toalign=False, labels=None, taskalign=False):
        f = x  # identity backbone; f must be [B, F]
        assert f.ndim == 2, f"Expected 2-D features, got {f.ndim}-D"
        b, fdim = f.shape
        assert fdim == self.fdim
        tb, bp = self._choose_tiling(b)
        f_pad = jnp.pad(f, ((0, bp - b), (0, self.fp - fdim)))

        if toalign:
            assert labels is not None, "labels should be assigned"
            lab = jnp.pad(labels.astype(jnp.int32).reshape(-1), (0, bp - b))
            lab2d = lab.reshape(bp, 1)
            f_pos, y_pos = _toalign_call(f_pad, self.w_cf, self.b_row,
                                         lab2d, tb)
            return f_pos[:b, :fdim], y_pos[:b, :self.num_classes]
        elif taskalign:
            f_pos, y_pos = _taskalign_call(f_pad, self.w_cf, self.b_row, tb)
            return f_pos[:b, :fdim], y_pos[:b, :self.num_classes]
        else:
            # identity backbone -> return the input as f (no kernel writeback)
            y = _plain_call(f_pad, self.w_cf, self.b_row, tb)
            return f, y[:b, :self.num_classes]


# ----------------------------------------------------------------------------
# Demo / smoke test
# ----------------------------------------------------------------------------
if __name__ == "__main__":
    B, FDIM, NUM_CLASSES = 8, 32, 16

    key = jax.random.PRNGKey(0)
    k_w, k_x, k_lbl = jax.random.split(key, 3)

    model = BaseModelPallas(fdim=FDIM, num_classes=NUM_CLASSES, key=k_w)

    x = jax.random.normal(k_x, (B, FDIM), jnp.float32)
    labels = jax.random.randint(k_lbl, (B,), 0, NUM_CLASSES, jnp.int32)

    # --- plain branch -------------------------------------------------------
    f_out, y_out = model.forward(x)
    jax.block_until_ready((f_out, y_out))
    assert f_out.shape == (B, FDIM) and y_out.shape == (B, NUM_CLASSES)
    y_ref = x @ model.fc_weight.T + model.fc_bias
    assert jnp.allclose(y_out, y_ref, atol=1e-5, rtol=1e-5)
    assert jnp.array_equal(f_out, x)

    # --- toalign branch -----------------------------------------------------
    f_pos, y_pos = model.forward(x, toalign=True, labels=labels)
    jax.block_until_ready((f_pos, y_pos))
    assert f_pos.shape == (B, FDIM) and y_pos.shape == (B, NUM_CLASSES)
    w_l = model.fc_weight[labels]
    eng_org = (x ** 2).sum(axis=1, keepdims=True)
    eng_aft = ((x * w_l) ** 2).sum(axis=1, keepdims=True)
    w_pos_ref = w_l * jnp.sqrt(eng_org / eng_aft)
    f_pos_ref = x * w_pos_ref
    y_pos_ref = f_pos_ref @ model.fc_weight.T + model.fc_bias
    assert jnp.allclose(f_pos, f_pos_ref, atol=1e-4, rtol=1e-4)
    assert jnp.allclose(y_pos, y_pos_ref, atol=1e-4, rtol=1e-4)

    # --- taskalign branch ---------------------------------------------------
    f_pos2, y_pos2 = model.forward(x, taskalign=True)
    jax.block_until_ready((f_pos2, y_pos2))
    assert f_pos2.shape == (B, FDIM) and y_pos2.shape == (B, NUM_CLASSES)
    pseudo = jnp.argmax(y_ref, axis=1)
    w_l2 = model.fc_weight[pseudo]
    eng_aft2 = ((x * w_l2) ** 2).sum(axis=1, keepdims=True)
    w_pos2_ref = w_l2 * jnp.sqrt(eng_org / eng_aft2)
    f_pos2_ref = x * w_pos2_ref
    y_pos2_ref = f_pos2_ref @ model.fc_weight.T + model.fc_bias
    assert jnp.allclose(f_pos2, f_pos2_ref, atol=1e-4, rtol=1e-4)
    assert jnp.allclose(y_pos2, y_pos2_ref, atol=1e-4, rtol=1e-4)

    print("KERNEL_OK")
</pallas_src>

<mosaic_0001>
module attributes {stable_mosaic.version = 11 : i64} {
  func.func @plain_kernel(%arg0: i32, %arg1: memref<8x128xf32, #tpu.memory_space<vmem>>, %arg2: memref<128x128xf32, #tpu.memory_space<vmem>>, %arg3: memref<1x128xf32, #tpu.memory_space<vmem>>, %arg4: memref<8x128xf32, #tpu.memory_space<vmem>>) attributes {dimension_semantics = [#tpu.dimension_semantics<parallel>], iteration_bounds = array<i64: 1>, scalar_prefetch = 0 : i64, scratch_operands = 0 : i64, tpu.core_type = #tpu.core_type<tc>, window_params = [{transform_indices = @transform_0, window_bounds = array<i64: 8, 128>}, {pipeline_mode = #tpu.pipeline_mode<synchronous>, transform_indices = @transform_1, window_bounds = array<i64: 128, 128>}, {pipeline_mode = #tpu.pipeline_mode<synchronous>, transform_indices = @transform_2, window_bounds = array<i64: 1, 128>}, {transform_indices = @transform_3, window_bounds = array<i64: 8, 128>}]} {
    %c0 = arith.constant 0 : index
    %c0_0 = arith.constant 0 : index
    %0 = vector.load %arg1[%c0, %c0_0] : memref<8x128xf32, #tpu.memory_space<vmem>>, vector<8x128xf32>
    %c0_1 = arith.constant 0 : index
    %c0_2 = arith.constant 0 : index
    %1 = vector.load %arg2[%c0_1, %c0_2] : memref<128x128xf32, #tpu.memory_space<vmem>>, vector<128x128xf32>
    %c0_3 = arith.constant 0 : index
    %c0_4 = arith.constant 0 : index
    %2 = vector.load %arg3[%c0_3, %c0_4] : memref<1x128xf32, #tpu.memory_space<vmem>>, vector<1x128xf32>
    %cst = arith.constant dense<0.000000e+00> : vector<8x128xf32>
    %3 = tpu.matmul %0, %1, %cst {dimension_numbers = #tpu.dot_dimension_numbers<[1], [1], [0], [0], [0, 0, 1, 0], [], []>} : vector<8x128xf32>, vector<128x128xf32>, vector<8x128xf32> -> vector<8x128xf32>
    %4 = vector.broadcast %2 : vector<1x128xf32> to vector<8x128xf32>
    %5 = arith.addf %3, %4 : vector<8x128xf32>
    %c0_5 = arith.constant 0 : index
    %c0_6 = arith.constant 0 : index
    %6 = vector.load %arg4[%c0_5, %c0_6] : memref<8x128xf32, #tpu.memory_space<vmem>>, vector<8x128xf32>
    tpu.vector_store %arg4[%c0_5, %c0_6], %5 {strides = array<i32>} : memref<8x128xf32, #tpu.memory_space<vmem>>, vector<8x128xf32>,
    return
  }
  func.func @transform_0(%arg0: i32) -> (i32, i32) {
    %c0_i32 = arith.constant 0 : i32
    %c0_i32_0 = arith.constant 0 : i32
    return %arg0, %c0_i32 : i32, i32
  }
  func.func @transform_1(%arg0: i32) -> (i32, i32) {
    %c0_i32 = arith.constant 0 : i32
    %c0_i32_0 = arith.constant 0 : i32
    %c0_i32_1 = arith.constant 0 : i32
    return %c0_i32, %c0_i32_0 : i32, i32
  }
  func.func @transform_2(%arg0: i32) -> (i32, i32) {
    %c0_i32 = arith.constant 0 : i32
    %c0_i32_0 = arith.constant 0 : i32
    %c0_i32_1 = arith.constant 0 : i32
    return %c0_i32, %c0_i32_0 : i32, i32
  }
  func.func @transform_3(%arg0: i32) -> (i32, i32) {
    %c0_i32 = arith.constant 0 : i32
    %c0_i32_0 = arith.constant 0 : i32
    return %arg0, %c0_i32 : i32, i32
  }
}

</mosaic_0001>

<bundles_post_ra>
// kernel: _plain_call.1
= control target key start
LH: loop header
LB: loop body
LE: loop exit
PB: predicated region body
PF: predicated region fallthrough
CT: control target
= control target key end

     0   :  { %8 = vsyncpa [#allocation3], 0  ;;  %s383_s0 = inlined_call_operand.hbm [shape: f32[8,128], index: 0, kind: input, shape index: {}]   ;;  %s384_s1 = inlined_call_operand.hbm [shape: f32[128,128], index: 1, kind: input, shape index: {}]   ;;  %s385_s2 = inlined_call_operand.vmem [shape: f32[1,128], index: 2, kind: input, shape index: {}]   ;;  %s386_s3 = inlined_call_operand.hbm [shape: f32[8,128], index: 3, kind: output, shape index: {}]  }
   0x1   :  { %9 = vsyncpa [#allocation6], 0 }
   0x2   :  { %10 = vsyncpa [#allocation4], 0  ;;  %s309_s12 = smov [#allocation2]   ;;  %s310_s14 = smov [#allocation5]  }
   0x3   :  { %s17_s13 = sshll.u32 %s309_s12, 4  ;;  %s26_s15 = sshll.u32 %s310_s14, 4  ;;  %s18_s13 = int_to_ptr.vmem [resolvable:$true] %s17_s13  ;;  %s337_s15 = int_to_ptr.vmem [resolvable:$true] %s26_s15 }
   0x4   :  { %s237_s18 = scalar_lea.hbm %s383_s0, 128 }
   0x5   :  { %p238_p0 = scmp.ne.s32.totalorder %s383_s0, %s237_s18  ;;  %p241_p1 = scmp.lt.u32.totalorder %s237_s18, %s383_s0 }
   0x7   :  { %p243_p2 = pnand %p241_p1, %p238_p0 }
   0x9   :  { %246 = shalt.err (!%p243_p2)
}
   0xa   :  { %s247_s23 = scalar_lea.vmem %s18_s13, 128  ;;  %p252_p4 = scmp.lt.s32.totalorder %s18_s13, %s18_s13 }
   0xb   :  { %p248_p3 = scmp.ne.s32.totalorder %s18_s13, %s247_s23  ;;  %p253_p5 = scmp.lt.s32.totalorder %s247_s23, %s247_s23 }
   0xd   :  { %p254_p6 = por %p253_p5, %p252_p4 }
   0xf   :  { %p255_p7 = pnand %p254_p6, %p248_p3 }
  0x11   :  { %258 = shalt.err (!%p255_p7)
}
  0x12   :  { %20 = dma.hbm_to_vmem [thread:$0]  %s383_s0, 128, %s18_s13, [#allocation3]  }
  0x13   :  { %s259_s28 = scalar_lea.hbm %s384_s1, 2048 }
  0x14   :  { %p260_p8 = scmp.ne.s32.totalorder %s384_s1, %s259_s28  ;;  %p263_p9 = scmp.lt.u32.totalorder %s259_s28, %s384_s1 }
  0x16   :  { %p265_p10 = pnand %p263_p9, %p260_p8 }
  0x18   :  { %268 = shalt.err (!%p265_p10)
}
  0x19   :  { %s269_s6 = scalar_lea.vmem %s337_s15, 2048  ;;  %p274_p12 = scmp.lt.s32.totalorder %s337_s15, %s337_s15 }
  0x1a   :  { %p270_p11 = scmp.ne.s32.totalorder %s337_s15, %s269_s6  ;;  %p275_p13 = scmp.lt.s32.totalorder %s269_s6, %s269_s6 }
  0x1c   :  { %p276_p0 = por %p275_p13, %p274_p12 }
  0x1e   :  { %p277_p1 = pnand %p276_p0, %p270_p11 }
  0x20   :  { %280 = shalt.err (!%p277_p1)
}
  0x21   :  { %s311_s0 = smov 128   ;;  %s312_s7 = smov 8  }
  0x22   :  { %32 = dma.hbm_to_vmem [thread:$0]  %s384_s1, 2048, %s337_s15, [#allocation6], %s311_s0, %s311_s0, %s312_s7  }
  0x23   :  { %303 = dma.done.wait [#allocation3], 128  }
  0x24   :  { %304 = vsyncadd [#allocation3], 4294967168 }
  0x25   :  { %305 = dma.done.wait [#allocation6], 2048  }
  0x26   :  { %306 = vsyncadd [#allocation6], 4294965248  ;;  %v313_v0 = vmov 0.0|0.0   ;;  %vm314_vm0 = vmmov 0   ;;  %v315_v1 = vmov 0.0   ;;  %v42_v2 = vld [vmem:[#allocation5] sm:$0xff] }
  0x27   :  { %205 = vmatprep.subr.bf16.mxu0 %v313_v0  ;;  %202 = vmatprep.mubr.msk.f32.mxu0 %vm314_vm0, %v315_v1  ;;  %v43_v3 = vld [vmem:[#allocation5 + $0x8] sm:$0xff]  ;;  %v44_v5 = vld [vmem:[#allocation5 + $0x10] sm:$0xff]  ;;  %v45_v6 = vld [vmem:[#allocation5 + $0x18] sm:$0xff]  ;;  %s316_s11 = smov [#allocation7]  }
  0x28   :  { %v206_v4 = vpack.c.bf16 %v43_v3, %v42_v2  ;;  %v209_v7 = vpack.c.bf16 %v45_v6, %v44_v5  ;;  %v46_v8 = vld [vmem:[#allocation5 + $0x20] sm:$0xff]  ;;  %v47_v9 = vld [vmem:[#allocation5 + $0x28] sm:$0xff]  ;;  %v48_v11 = vld [vmem:[#allocation5 + $0x30] sm:$0xff]  ;;  %s142_s12 = sshll.u32 %s316_s11, 4  ;;  %s143_s12 = int_to_ptr.vmem [resolvable:$true] %s142_s12 }
  0x29   :  { %v212_v10 = vpack.c.bf16 %v47_v9, %v46_v8  ;;  %v49_v12 = vld [vmem:[#allocation5 + $0x38] sm:$0xff]  ;;  %v50_v14 = vld [vmem:[#allocation5 + $0x40] sm:$0xff]  ;;  %v51_v15 = vld [vmem:[#allocation5 + $0x48] sm:$0xff]  ;;  %s281_s13 = scalar_lea.vmem %s143_s12, 128  ;;  %p286_p3 = scmp.lt.s32.totalorder %s143_s12, %s143_s12 }
  0x2a   :  { %207 = vmatpush3.bf16.xpose.msra.mxu0 %v206_v4  ;;  %v215_v13 = vpack.c.bf16 %v49_v12, %v48_v11  ;;  %v218_v16 = vpack.c.bf16 %v51_v15, %v50_v14  ;;  %v52_v17 = vld [vmem:[#allocation5 + $0x50] sm:$0xff]  ;;  %v53_v18 = vld [vmem:[#allocation5 + $0x58] sm:$0xff]  ;;  %v54_v20 = vld [vmem:[#allocation5 + $0x60] sm:$0xff]  ;;  %p282_p2 = scmp.ne.s32.totalorder %s143_s12, %s281_s13  ;;  %p287_p4 = scmp.lt.s32.totalorder %s281_s13, %s281_s13 }
  0x2b   :  { %208 = vmatprep.subr.bf16.mxu0 %v313_v0  ;;  %v221_v19 = vpack.c.bf16 %v53_v18, %v52_v17  ;;  %v55_v21 = vld [vmem:[#allocation5 + $0x68] sm:$0xff]  ;;  %v56_v23 = vld [vmem:[#allocation5 + $0x70] sm:$0xff]  ;;  %v57_v24 = vld [vmem:[#allocation5 + $0x78] sm:$0xff] }
  0x2c   :  { %v224_v22 = vpack.c.bf16 %v55_v21, %v54_v20  ;;  %v227_v25 = vpack.c.bf16 %v57_v24, %v56_v23  ;;  %v41_v26 = vld [vmem:[#allocation2] sm:$0xff]  ;;  %p288_p5 = por %p287_p4, %p286_p3 }
  0x2d   :  { %v152_v27 = vld [vmem:[%s385_s2] ss:$0 sm:$0xff] }
  0x2e   :  { %p289_p6 = pnand %p288_p5, %p282_p2 }
  0x32   :  { %210 = vmatpush3.bf16.xpose.msra.mxu0 %v209_v7 }
  0x33   :  { %211 = vmatprep.subr.bf16.mxu0 %v313_v0 }
  0x3a   :  { %213 = vmatpush3.bf16.xpose.msra.mxu0 %v212_v10 }
  0x3b   :  { %214 = vmatprep.subr.bf16.mxu0 %v313_v0 }
  0x42   :  { %216 = vmatpush3.bf16.xpose.msra.mxu0 %v215_v13 }
  0x43   :  { %217 = vmatprep.subr.bf16.mxu0 %v313_v0 }
  0x4a   :  { %219 = vmatpush3.bf16.xpose.msra.mxu0 %v218_v16 }
  0x4b   :  { %220 = vmatprep.subr.bf16.mxu0 %v313_v0 }
  0x52   :  { %222 = vmatpush3.bf16.xpose.msra.mxu0 %v221_v19 }
  0x53   :  { %223 = vmatprep.subr.bf16.mxu0 %v313_v0 }
  0x5a   :  { %225 = vmatpush3.bf16.xpose.msra.mxu0 %v224_v22 }
  0x5b   :  { %226 = vmatprep.subr.bf16.mxu0 %v313_v0 }
  0x62   :  { %228 = vmatpush3.bf16.xpose.msra.mxu0 %v227_v25 }
  0x69   :  { %203 = vmatmul.mubr.f32.vlgmr.msra.gmra.mrb[0].mxu0 %v41_v26 }
 0x13c   :  { %v131_v28 = vpop.f32.mrb[0].mxu0 }
 0x13d   :  { %v132_v29 = vadd.f32 %v152_v27, %v131_v28  ;;  %v204_v30 = vpop.f32.mrb[1].mxu0 }
 0x13f   :  { %135 = vst [vmem:[#allocation7] sm:$0xff] %v132_v29 }
 0x140   :  { %292 = shalt.err (!%p289_p6)
}
 0x141   :  { %s293_s16 = scalar_lea.hbm %s386_s3, 128 }
 0x142   :  { %p294_p7 = scmp.ne.s32.totalorder %s386_s3, %s293_s16  ;;  %p297_p8 = scmp.lt.u32.totalorder %s293_s16, %s386_s3 }
 0x144   :  { %p299_p9 = pnand %p297_p8, %p294_p7 }
 0x146   :  { %302 = shalt.err (!%p299_p9)
}
 0x147   :  { %145 = dma.vmem_to_hbm [thread:$0]  %s143_s12, 128, %s386_s3, [#allocation4]  }
 0x148   :  { %307 = dma.done.wait [#allocation4], 128  }
 0x149   :  { %308 = vsyncadd [#allocation4], 4294967168 }
 0x14a   :  { %149 = vsyncpa [#allocation3], 1 }
 0x14b   :  { %150 = vsyncpa [#allocation6], 1 }
 0x14c   :  { %151 = vsyncpa [#allocation4], 1 }

</bundles_post_ra>
